<compile_context>
chip_gen: v7x
topology: tpu7x:2x2x1
jax: 0.10.0
libtpu: 0.0.40
codegen_flags: <defaults>
</compile_context>

<pallas_src>
import jax
import jax.numpy as jnp
from jax.experimental import pallas as pl
from jax.experimental.pallas import tpu as pltpu


def _round_up(x, m):
    return ((x + m - 1) // m) * m


def _vmem_spec():
    return pl.BlockSpec(memory_space=pltpu.MemorySpace.VMEM)


# ----------------------------- Fused Pallas kernel --------------------------

def _make_fused_kernel(num_layers, batch, hidden):
    """Kernel signature: kernel(x, [w_l, b_l]*L, c0, fc_w, fc_b, out)

    Pre-prepared operands (done once at init, not per call):
       x    : (B, F)           f32
       w_l  : (in_dim_l, 4*H)  bf16   gate order [i, f, g, o]; in_dim_0 = F, else H
       b_l  : (1, 4*H)         f32    b_ih + b_hh
       c0   : (L, B, H)        f32
       fc_w : (H, OP)          bf16   OP = round_up(outputSize, 128), zero-padded cols
       fc_b : (1, OP)          f32
       out  : (L*B, OP)        f32
    Valid only for seq_len == 1 with h_0 == 0 (the W_hh contribution is exactly 0).
    """
    H = hidden

    def kernel(*refs):
        x_ref = refs[0]
        c0_ref = refs[1 + 2 * num_layers]
        fc_w_ref = refs[2 + 2 * num_layers]
        fc_b_ref = refs[3 + 2 * num_layers]
        out_ref = refs[4 + 2 * num_layers]

        fc_w = fc_w_ref[...]            # (H, OP) bf16
        fc_b = fc_b_ref[...]            # (1, OP) f32

        inp = x_ref[...]                # f32 activations
        for l in range(num_layers):
            w = refs[1 + 2 * l][...]    # (in_dim, 4H) bf16
            b = refs[2 + 2 * l][...]    # (1, 4H)  f32

            # seq_len == 1 and h_0 == 0  =>  h @ W_hh is identically zero.
            gates = (
                jnp.dot(inp.astype(jnp.bfloat16), w,
                        preferred_element_type=jnp.float32)
                + b
            )
            # 4*H == 128 for H=32: contiguous gates, plain lane slices.
            i_g = jax.nn.sigmoid(gates[:, 0 * H:1 * H])
            f_g = jax.nn.sigmoid(gates[:, 1 * H:2 * H])
            g_g = jnp.tanh(gates[:, 2 * H:3 * H])
            o_g = jax.nn.sigmoid(gates[:, 3 * H:4 * H])

            c_new = f_g * c0_ref[l] + i_g * g_g     # c_new never leaves VMEM
            h_new = o_g * jnp.tanh(c_new)

            # fc contribution of this layer written directly to the output slab
            # (no h scratch round-trip); static row offset, lane-dense 128 wide.
            out_ref[l * batch:(l + 1) * batch, :] = (
                jnp.dot(h_new.astype(jnp.bfloat16), fc_w,
                        preferred_element_type=jnp.float32)
                + fc_b
            )
            inp = h_new                              # next layer's input

    return kernel


# ----------------------------- Parameter handling ---------------------------

def init_params(key, input_size, hidden_size, output_size, num_layers):
    """Uniform(-1/sqrt(H), 1/sqrt(H)) init mirroring nn.LSTM / nn.Linear (f32, unpadded)."""
    params = {"layers": []}
    bound = 1.0 / jnp.sqrt(jnp.float32(hidden_size))
    for l in range(num_layers):
        in_dim = input_size if l == 0 else hidden_size
        key, k1, k2, k3, k4 = jax.random.split(key, 5)
        w_ih = jax.random.uniform(k1, (in_dim, 4 * hidden_size), jnp.float32, -bound, bound)
        w_hh = jax.random.uniform(k2, (hidden_size, 4 * hidden_size), jnp.float32, -bound, bound)
        b_ih = jax.random.uniform(k3, (4 * hidden_size,), jnp.float32, -bound, bound)
        b_hh = jax.random.uniform(k4, (4 * hidden_size,), jnp.float32, -bound, bound)
        # w_hh is kept only for the pure-JAX reference; the kernel never uses it
        # (its contribution is exactly zero for seq_len == 1, h_0 == 0).
        params["layers"].append(
            {"w_ih": w_ih, "w_hh": w_hh, "b": (b_ih + b_hh).reshape(1, -1)}
        )
    key, k5, k6 = jax.random.split(key, 3)
    params["fc_w"] = jax.random.uniform(k5, (hidden_size, output_size), jnp.float32, -bound, bound)
    params["fc_b"] = jax.random.uniform(k6, (1, output_size), jnp.float32, -bound, bound)
    return params


def prepare_kernel_params(params, num_layers):
    """ONE-TIME (init-time) prep: bf16 weight cast + fc output-column padding to a
    full 128-lane block.  NOT on the per-call path (per review item 1)."""
    O = params["fc_w"].shape[1]
    OP = _round_up(O, 128)
    prepared = []
    for l in range(num_layers):
        p = params["layers"][l]
        prepared.append(p["w_ih"].astype(jnp.bfloat16))   # (in_dim, 4H) bf16
        prepared.append(p["b"])                            # (1, 4H) f32
    fc_w = jnp.pad(params["fc_w"], ((0, 0), (0, OP - O))).astype(jnp.bfloat16)
    fc_b = jnp.pad(params["fc_b"], ((0, 0), (0, OP - O)))
    prepared += [fc_w, fc_b]
    return tuple(prepared)


# ----------------------------- Forward (Pallas) ------------------------------

def make_lstm_forward(input_size, hidden_size, output_size, num_layers, batch):
    """Returns a jitted forward: (kernel_params, x, c0) -> (numLayer*batch, outputSize)."""
    H, O, F, B, L = hidden_size, output_size, input_size, batch, num_layers
    OP = _round_up(O, 128)

    kernel = _make_fused_kernel(L, B, H)
    n_in = 1 + 2 * L + 3

    # Advisory cost estimate, computed on real (unpadded) dims except OP columns.
    flops = 2 * B * F * 4 * H                      # layer-0 gate matmul
    flops += 2 * B * H * 4 * H * (L - 1)           # deeper-layer gate matmuls
    flops += 2 * L * B * H * OP                    # fc matmuls
    flops += 10 * B * H * L                        # gate elementwise
    transcendentals = 5 * B * H * L                # 3 sigmoid + 2 tanh per layer

    @jax.jit
    def forward(kernel_params, x, c0):
        layer_wb = kernel_params[:2 * L]
        fc_w, fc_b = kernel_params[2 * L], kernel_params[2 * L + 1]
        operands = (x, *layer_wb, c0, fc_w, fc_b)
        bytes_accessed = int(
            sum(a.size * a.dtype.itemsize for a in operands) + L * B * OP * 4
        )

        out_padded = pl.pallas_call(
            kernel,
            out_shape=jax.ShapeDtypeStruct((L * B, OP), jnp.float32),
            in_specs=[_vmem_spec()] * n_in,
            out_specs=_vmem_spec(),
            compiler_params=pltpu.CompilerParams(),
            cost_estimate=pl.CostEstimate(
                flops=flops,
                transcendentals=transcendentals,
                bytes_accessed=bytes_accessed,
            ),
        )(*operands)

        # Lane-dense (L*B, 128) slab stored unmasked in the kernel; the real O
        # columns are sliced here, fused into the same jit (no extra dispatch).
        return out_padded[:, :O]

    return forward


# ----------------------------- Pure-JAX reference ----------------------------

def lstm_forward_ref(params, x, c0, hidden_size, num_layers):
    B = x.shape[0]
    H = hidden_size
    layer_input = x
    h_finals = []
    for l in range(num_layers):
        p = params["layers"][l]
        h = jnp.zeros((B, H), jnp.float32)
        c = c0[l]
        gates = layer_input @ p["w_ih"] + h @ p["w_hh"] + p["b"]
        i_g = jax.nn.sigmoid(gates[:, :H])
        f_g = jax.nn.sigmoid(gates[:, H:2 * H])
        g_g = jnp.tanh(gates[:, 2 * H:3 * H])
        o_g = jax.nn.sigmoid(gates[:, 3 * H:])
        c_new = f_g * c + i_g * g_g
        h_new = o_g * jnp.tanh(c_new)
        h_finals.append(h_new)
        layer_input = h_new
    h_out = jnp.concatenate(h_finals, axis=0)
    return h_out @ params["fc_w"] + params["fc_b"]


# --------------------------------- Main --------------------------------------

if __name__ == "__main__":
    batch_size = 4
    input_size = 8
    hidden_size = 32
    output_size = 4
    num_layers = 2

    key = jax.random.PRNGKey(0)
    key, kx, kc, kp = jax.random.split(key, 4)

    x = jax.random.normal(kx, (batch_size, input_size), jnp.float32)
    # c_0 = torch.randn(numLayer, batch, hidden) in the reference forward;
    # generated here deterministically from the PRNGKey.
    c0 = jax.random.normal(kc, (num_layers, batch_size, hidden_size), jnp.float32)

    params = init_params(kp, input_size, hidden_size, output_size, num_layers)
    # One-time weight prep (bf16 cast + fc column padding) -- cached, off the hot path.
    kernel_params = prepare_kernel_params(params, num_layers)
    forward = make_lstm_forward(input_size, hidden_size, output_size, num_layers, batch_size)

    out = forward(kernel_params, x, c0)
    out = jax.block_until_ready(out)

    ref = lstm_forward_ref(params, x, c0, hidden_size, num_layers)
    assert out.shape == (num_layers * batch_size, output_size), out.shape
    # Tolerance reflects bf16 matmul operands (f32 accumulation, f32 nonlinearities).
    assert jnp.allclose(out, ref, atol=5e-2, rtol=5e-2), "mismatch vs reference"

    print("KERNEL_OK")
</pallas_src>

<mosaic_0001>
module attributes {stable_mosaic.version = 11 : i64} {
  func.func @kernel(%arg0: memref<4x8xf32, #tpu.memory_space<vmem>>, %arg1: memref<8x128xbf16, #tpu.memory_space<vmem>>, %arg2: memref<1x128xf32, #tpu.memory_space<vmem>>, %arg3: memref<32x128xbf16, #tpu.memory_space<vmem>>, %arg4: memref<1x128xf32, #tpu.memory_space<vmem>>, %arg5: memref<2x4x32xf32, #tpu.memory_space<vmem>>, %arg6: memref<32x128xbf16, #tpu.memory_space<vmem>>, %arg7: memref<1x128xf32, #tpu.memory_space<vmem>>, %arg8: memref<8x128xf32, #tpu.memory_space<vmem>>) attributes {dimension_semantics = [], scalar_prefetch = 0 : i64, scratch_operands = 0 : i64, tpu.core_type = #tpu.core_type<tc>} {
    %c0 = arith.constant 0 : index
    %c0_0 = arith.constant 0 : index
    %0 = vector.load %arg6[%c0, %c0_0] : memref<32x128xbf16, #tpu.memory_space<vmem>>, vector<32x128xbf16>
    %c0_1 = arith.constant 0 : index
    %c0_2 = arith.constant 0 : index
    %1 = vector.load %arg7[%c0_1, %c0_2] : memref<1x128xf32, #tpu.memory_space<vmem>>, vector<1x128xf32>
    %c0_3 = arith.constant 0 : index
    %c0_4 = arith.constant 0 : index
    %2 = vector.load %arg0[%c0_3, %c0_4] : memref<4x8xf32, #tpu.memory_space<vmem>>, vector<4x8xf32>
    %c0_5 = arith.constant 0 : index
    %c0_6 = arith.constant 0 : index
    %3 = vector.load %arg1[%c0_5, %c0_6] : memref<8x128xbf16, #tpu.memory_space<vmem>>, vector<8x128xbf16>
    %c0_7 = arith.constant 0 : index
    %c0_8 = arith.constant 0 : index
    %4 = vector.load %arg2[%c0_7, %c0_8] : memref<1x128xf32, #tpu.memory_space<vmem>>, vector<1x128xf32>
    %5 = arith.truncf %2 : vector<4x8xf32> to vector<4x8xbf16>
    %cst = arith.constant dense<0.000000e+00> : vector<4x128xf32>
    %6 = tpu.matmul %5, %3, %cst {dimension_numbers = #tpu.dot_dimension_numbers<[1], [0], [0], [1], [0, 0, 1, 1], [], []>} : vector<4x8xbf16>, vector<8x128xbf16>, vector<4x128xf32> -> vector<4x128xf32>
    %7 = vector.broadcast %4 : vector<1x128xf32> to vector<4x128xf32>
    %8 = arith.addf %6, %7 : vector<4x128xf32>
    %9 = vector.extract_strided_slice %8 {offsets = [0, 0], sizes = [4, 32], strides = [1, 1]} : vector<4x128xf32> to vector<4x32xf32>
    %10 = arith.negf %9 : vector<4x32xf32>
    %11 = math.exp %10 : vector<4x32xf32>
    %cst_9 = arith.constant 1.000000e+00 : f32
    %12 = vector.broadcast %cst_9 : f32 to vector<4x32xf32>
    %13 = arith.addf %12, %11 : vector<4x32xf32>
    %14 = arith.divf %12, %13 : vector<4x32xf32>
    %15 = vector.extract_strided_slice %8 {offsets = [0, 32], sizes = [4, 32], strides = [1, 1]} : vector<4x128xf32> to vector<4x32xf32>
    %16 = arith.negf %15 : vector<4x32xf32>
    %17 = math.exp %16 : vector<4x32xf32>
    %cst_10 = arith.constant 1.000000e+00 : f32
    %18 = vector.broadcast %cst_10 : f32 to vector<4x32xf32>
    %19 = arith.addf %18, %17 : vector<4x32xf32>
    %20 = arith.divf %18, %19 : vector<4x32xf32>
    %21 = vector.extract_strided_slice %8 {offsets = [0, 64], sizes = [4, 32], strides = [1, 1]} : vector<4x128xf32> to vector<4x32xf32>
    %22 = math.tanh %21 : vector<4x32xf32>
    %23 = vector.extract_strided_slice %8 {offsets = [0, 96], sizes = [4, 32], strides = [1, 1]} : vector<4x128xf32> to vector<4x32xf32>
    %24 = arith.negf %23 : vector<4x32xf32>
    %25 = math.exp %24 : vector<4x32xf32>
    %cst_11 = arith.constant 1.000000e+00 : f32
    %26 = vector.broadcast %cst_11 : f32 to vector<4x32xf32>
    %27 = arith.addf %26, %25 : vector<4x32xf32>
    %28 = arith.divf %26, %27 : vector<4x32xf32>
    %c0_12 = arith.constant 0 : index
    %c0_13 = arith.constant 0 : index
    %c0_14 = arith.constant 0 : index
    %29 = vector.load %arg5[%c0_12, %c0_13, %c0_14] : memref<2x4x32xf32, #tpu.memory_space<vmem>>, vector<1x4x32xf32>
    %30 = vector.shape_cast %29 : vector<1x4x32xf32> to vector<4x32xf32>
    %31 = arith.mulf %20, %30 : vector<4x32xf32>
    %32 = arith.mulf %14, %22 : vector<4x32xf32>
    %33 = arith.addf %31, %32 : vector<4x32xf32>
    %34 = math.tanh %33 : vector<4x32xf32>
    %35 = arith.mulf %28, %34 : vector<4x32xf32>
    %36 = arith.truncf %35 : vector<4x32xf32> to vector<4x32xbf16>
    %cst_15 = arith.constant dense<0.000000e+00> : vector<4x128xf32>
    %37 = tpu.matmul %36, %0, %cst_15 {dimension_numbers = #tpu.dot_dimension_numbers<[1], [0], [0], [1], [0, 0, 1, 1], [], []>} : vector<4x32xbf16>, vector<32x128xbf16>, vector<4x128xf32> -> vector<4x128xf32>
    %38 = vector.broadcast %1 : vector<1x128xf32> to vector<4x128xf32>
    %39 = arith.addf %37, %38 : vector<4x128xf32>
    %c0_16 = arith.constant 0 : index
    %c0_17 = arith.constant 0 : index
    %40 = vector.load %arg8[%c0_16, %c0_17] : memref<8x128xf32, #tpu.memory_space<vmem>>, vector<4x128xf32>
    tpu.vector_store %arg8[%c0_16, %c0_17], %39 {strides = array<i32>} : memref<8x128xf32, #tpu.memory_space<vmem>>, vector<4x128xf32>,
    %c0_18 = arith.constant 0 : index
    %c0_19 = arith.constant 0 : index
    %41 = vector.load %arg3[%c0_18, %c0_19] : memref<32x128xbf16, #tpu.memory_space<vmem>>, vector<32x128xbf16>
    %c0_20 = arith.constant 0 : index
    %c0_21 = arith.constant 0 : index
    %42 = vector.load %arg4[%c0_20, %c0_21] : memref<1x128xf32, #tpu.memory_space<vmem>>, vector<1x128xf32>
    %43 = arith.truncf %35 : vector<4x32xf32> to vector<4x32xbf16>
    %cst_22 = arith.constant dense<0.000000e+00> : vector<4x128xf32>
    %44 = tpu.matmul %43, %41, %cst_22 {dimension_numbers = #tpu.dot_dimension_numbers<[1], [0], [0], [1], [0, 0, 1, 1], [], []>} : vector<4x32xbf16>, vector<32x128xbf16>, vector<4x128xf32> -> vector<4x128xf32>
    %45 = vector.broadcast %42 : vector<1x128xf32> to vector<4x128xf32>
    %46 = arith.addf %44, %45 : vector<4x128xf32>
    %47 = vector.extract_strided_slice %46 {offsets = [0, 0], sizes = [4, 32], strides = [1, 1]} : vector<4x128xf32> to vector<4x32xf32>
    %48 = arith.negf %47 : vector<4x32xf32>
    %49 = math.exp %48 : vector<4x32xf32>
    %cst_23 = arith.constant 1.000000e+00 : f32
    %50 = vector.broadcast %cst_23 : f32 to vector<4x32xf32>
    %51 = arith.addf %50, %49 : vector<4x32xf32>
    %52 = arith.divf %50, %51 : vector<4x32xf32>
    %53 = vector.extract_strided_slice %46 {offsets = [0, 32], sizes = [4, 32], strides = [1, 1]} : vector<4x128xf32> to vector<4x32xf32>
    %54 = arith.negf %53 : vector<4x32xf32>
    %55 = math.exp %54 : vector<4x32xf32>
    %cst_24 = arith.constant 1.000000e+00 : f32
    %56 = vector.broadcast %cst_24 : f32 to vector<4x32xf32>
    %57 = arith.addf %56, %55 : vector<4x32xf32>
    %58 = arith.divf %56, %57 : vector<4x32xf32>
    %59 = vector.extract_strided_slice %46 {offsets = [0, 64], sizes = [4, 32], strides = [1, 1]} : vector<4x128xf32> to vector<4x32xf32>
    %60 = math.tanh %59 : vector<4x32xf32>
    %61 = vector.extract_strided_slice %46 {offsets = [0, 96], sizes = [4, 32], strides = [1, 1]} : vector<4x128xf32> to vector<4x32xf32>
    %62 = arith.negf %61 : vector<4x32xf32>
    %63 = math.exp %62 : vector<4x32xf32>
    %cst_25 = arith.constant 1.000000e+00 : f32
    %64 = vector.broadcast %cst_25 : f32 to vector<4x32xf32>
    %65 = arith.addf %64, %63 : vector<4x32xf32>
    %66 = arith.divf %64, %65 : vector<4x32xf32>
    %c1 = arith.constant 1 : index
    %c0_26 = arith.constant 0 : index
    %c0_27 = arith.constant 0 : index
    %67 = vector.load %arg5[%c1, %c0_26, %c0_27] : memref<2x4x32xf32, #tpu.memory_space<vmem>>, vector<1x4x32xf32>
    %68 = vector.shape_cast %67 : vector<1x4x32xf32> to vector<4x32xf32>
    %69 = arith.mulf %58, %68 : vector<4x32xf32>
    %70 = arith.mulf %52, %60 : vector<4x32xf32>
    %71 = arith.addf %69, %70 : vector<4x32xf32>
    %72 = math.tanh %71 : vector<4x32xf32>
    %73 = arith.mulf %66, %72 : vector<4x32xf32>
    %74 = arith.truncf %73 : vector<4x32xf32> to vector<4x32xbf16>
    %cst_28 = arith.constant dense<0.000000e+00> : vector<4x128xf32>
    %75 = tpu.matmul %74, %0, %cst_28 {dimension_numbers = #tpu.dot_dimension_numbers<[1], [0], [0], [1], [0, 0, 1, 1], [], []>} : vector<4x32xbf16>, vector<32x128xbf16>, vector<4x128xf32> -> vector<4x128xf32>
    %76 = vector.broadcast %1 : vector<1x128xf32> to vector<4x128xf32>
    %77 = arith.addf %75, %76 : vector<4x128xf32>
    %c4 = arith.constant 4 : index
    %c0_29 = arith.constant 0 : index
    %78 = vector.load %arg8[%c4, %c0_29] : memref<8x128xf32, #tpu.memory_space<vmem>>, vector<4x128xf32>
    tpu.vector_store %arg8[%c4, %c0_29], %77 {strides = array<i32>} : memref<8x128xf32, #tpu.memory_space<vmem>>, vector<4x128xf32>,
    return
  }
}

</mosaic_0001>

<bundles_post_ra>
// kernel: forward.1
= control target key start
LH: loop header
LB: loop body
LE: loop exit
PB: predicated region body
PF: predicated region fallthrough
CT: control target
= control target key end

     0   :  { %13 = vsyncpa [#allocation3], 0  ;;  %s675_s0 = inlined_call_operand.vmem [shape: f32[4,8], index: 0, kind: input, shape index: {}]   ;;  %s676_s1 = inlined_call_operand.hbm [shape: bf16[8,128], index: 1, kind: input, shape index: {}]   ;;  %s677_s2 = inlined_call_operand.vmem [shape: f32[1,128], index: 2, kind: input, shape index: {}]   ;;  %s678_s3 = inlined_call_operand.hbm [shape: bf16[32,128], index: 3, kind: input, shape index: {}]   ;;  %s679_s4 = inlined_call_operand.vmem [shape: f32[1,128], index: 4, kind: input, shape index: {}]   ;;  %s680_s5 = inlined_call_operand.vmem [shape: f32[2,4,32], index: 5, kind: input, shape index: {}]   ;;  %s681_s6 = inlined_call_operand.hbm [shape: bf16[32,128], index: 6, kind: input, shape index: {}]   ;;  %s682_s7 = inlined_call_operand.vmem [shape: f32[1,128], index: 7, kind: input, shape index: {}]   ;;  %s683_s8 = inlined_call_operand.vmem [shape: f32[8,128], index: 8, kind: output, shape index: {}]  }
   0x1   :  { %14 = vsyncpa [#allocation5], 0  ;;  %s528_s27 = smov [#allocation4]   ;;  %s458_s9 = scalar_lea.hbm %s678_s3, 256 }
   0x2   :  { %s34_s28 = sshll.u32 %s528_s27, 4  ;;  %p459_p0 = scmp.ne.s32.totalorder %s678_s3, %s458_s9  ;;  %s35_s28 = int_to_ptr.vmem [resolvable:$true] %s34_s28 }
   0x3   :  { %p462_p1 = scmp.lt.u32.totalorder %s458_s9, %s678_s3 }
   0x5   :  { %p464_p2 = pnand %p462_p1, %p459_p0 }
   0x7   :  { %467 = shalt.err (!%p464_p2)
}
   0x8   :  { %s468_s14 = scalar_lea.vmem %s35_s28, 256  ;;  %p473_p4 = scmp.lt.s32.totalorder %s35_s28, %s35_s28 }
   0x9   :  { %p469_p3 = scmp.ne.s32.totalorder %s35_s28, %s468_s14  ;;  %p474_p5 = scmp.lt.s32.totalorder %s468_s14, %s468_s14 }
   0xb   :  { %p475_p6 = por %p474_p5, %p473_p4 }
   0xd   :  { %p476_p7 = pnand %p475_p6, %p469_p3 }
   0xf   :  { %479 = shalt.err (!%p476_p7)
}
  0x10   :  { %s529_s15 = smov 64   ;;  %s530_s16 = smov 4  }
  0x11   :  { %40 = dma.hbm_to_vmem [thread:$0]  %s678_s3, 256, %s35_s28, [#allocation5], %s529_s15, %s529_s15, %s530_s16  }
  0x12   :  { %s531_s19 = smov [#allocation2]   ;;  %s532_s21 = smov [#allocation6]  }
  0x13   :  { %s23_s20 = sshll.u32 %s531_s19, 4  ;;  %s50_s22 = sshll.u32 %s532_s21, 4  ;;  %s24_s20 = int_to_ptr.vmem [resolvable:$true] %s23_s20  ;;  %s51_s22 = int_to_ptr.vmem [resolvable:$true] %s50_s22 }
  0x14   :  { %s480_s25 = scalar_lea.hbm %s676_s1, 64 }
  0x15   :  { %p481_p8 = scmp.ne.s32.totalorder %s676_s1, %s480_s25  ;;  %p484_p9 = scmp.lt.u32.totalorder %s480_s25, %s676_s1 }
  0x17   :  { %p486_p10 = pnand %p484_p9, %p481_p8 }
  0x19   :  { %489 = shalt.err (!%p486_p10)
}
  0x1a   :  { %s490_s3 = scalar_lea.vmem %s24_s20, 64  ;;  %p495_p12 = scmp.lt.s32.totalorder %s24_s20, %s24_s20 }
  0x1b   :  { %p491_p11 = scmp.ne.s32.totalorder %s24_s20, %s490_s3  ;;  %p496_p13 = scmp.lt.s32.totalorder %s490_s3, %s490_s3 }
  0x1d   :  { %p497_p0 = por %p496_p13, %p495_p12 }
  0x1f   :  { %p498_p1 = pnand %p497_p0, %p491_p11 }
  0x21   :  { %501 = shalt.err (!%p498_p1)
}
  0x22   :  { %26 = dma.hbm_to_vmem [thread:$0]  %s676_s1, 64, %s24_s20, [#allocation3]  }
  0x23   :  { %s502_s12 = scalar_lea.hbm %s681_s6, 256 }
  0x24   :  { %p503_p2 = scmp.ne.s32.totalorder %s681_s6, %s502_s12  ;;  %p506_p3 = scmp.lt.u32.totalorder %s502_s12, %s681_s6 }
  0x26   :  { %p508_p4 = pnand %p506_p3, %p503_p2 }
  0x28   :  { %511 = shalt.err (!%p508_p4)
}
  0x29   :  { %s512_s19 = scalar_lea.vmem %s51_s22, 256  ;;  %p517_p6 = scmp.lt.s32.totalorder %s51_s22, %s51_s22 }
  0x2a   :  { %p513_p5 = scmp.ne.s32.totalorder %s51_s22, %s512_s19  ;;  %p518_p7 = scmp.lt.s32.totalorder %s512_s19, %s512_s19 }
  0x2c   :  { %p519_p8 = por %p518_p7, %p517_p6 }
  0x2e   :  { %p520_p9 = pnand %p519_p8, %p513_p5 }
  0x30   :  { %523 = shalt.err (!%p520_p9)
}
  0x31   :  { %56 = dma.hbm_to_vmem [thread:$0]  %s681_s6, 256, %s51_s22, [#allocation5], %s529_s15, %s529_s15, %s530_s16  }
  0x32   :  { %524 = dma.done.wait [#allocation3], 64  }
  0x33   :  { %525 = vsyncadd [#allocation3], 4294967232 }
  0x34   :  { %526 = dma.done.wait [#allocation5], 512  }
  0x35   :  { %527 = vsyncadd [#allocation5], 4294966784  ;;  %v533_v0 = vmov 0.0   ;;  %vm534_vm0 = vmmov 0   ;;  %vm88_vm1 = vcmask 1043456   ;;  %vm84_vm2 = vcmask 64512  }
  0x36   :  { %400 = vmatprep.subr.bf16.mxu0 %v533_v0  ;;  %402 = vmatprep.mubr.msk.bf16.mxu0 %vm534_vm0, %v533_v0  ;;  %v75_v1 = vld [vmem:[#allocation2] sm:$0xf]  ;;  %v74_v2 = vld [vmem:[%s675_s0] sm:$0xf]  ;;  %s535_s24 = smov 32   ;;  %v438_v23 = vld [vmem:[#allocation4] sm:$0xff]  }
  0x37   :  { %406 = vmatprep.subr.bf16.mxu1 %v533_v0  ;;  %410 = vmatprep.mubr.msk.bf16.mxu1 %vm534_vm0, %v533_v0  ;;  %v90_v3 = vsel %vm88_vm1, %v75_v1, 0  ;;  %v77_v4 = vpack.c.bf16 %v74_v2, %v74_v2  ;;  %v375_v5 = vld [vmem:[%s677_s2] ss:$0 sm:$0xff]  ;;  %v440_v25 = vld [vmem:[#allocation4 + $0x8] sm:$0xff]   ;;  %v441_v26 = vld [vmem:[#allocation6 + $0x8] sm:$0xff]   ;;  %vm183_vm3 = vcmask 261120  }
  0x38   :  { %401 = vmatpush3.bf16.msra.mxu0 %v90_v3  ;;  %v139_v12 = vld [vmem:[%s680_s5] sm:$0xf]  ;;  %v387_v31 = vld [vmem:[%s680_s5 + $0x4] sm:$0xf] }
  0x39   :  { %414 = vmatprep.subr.bf16.mxu0 %v533_v0  ;;  %v439_v24 = vld [vmem:[#allocation6] sm:$0xff]  }
  0x3a   :  { %407 = vmatpush3.bf16.msra.mxu1 %v439_v24  ;;  %v378_v33 = vld [vmem:[%s682_s7] ss:$0 sm:$0xff] }
  0x3b   :  { %403 = vmatmul.mubr.msk.bf16.vlgmr.msra.gmra.mrb[0].mxu0 %vm84_vm2, %v77_v4  ;;  %408 = vmatprep.subr.bf16.mxu1 %v533_v0  ;;  %v382_v34 = vld [vmem:[%s679_s4] ss:$0 sm:$0xff] }
  0x3c   :  { %418 = vmatprep.mubr.msk.bf16.mxu0 %vm534_vm0, %v533_v0  ;;  %415 = vmatpush3.bf16.msra.mxu0 %v438_v23 }
  0x3d   :  { %416 = vmatprep.subr.bf16.mxu0 %v533_v0 }
  0x3e   :  { %409 = vmatpush3.bf16.msra.mxu1 %v441_v26 }
  0x3f   :  { %422 = vmatprep.subr.bf16.mxu1 %v533_v0 }
  0x40   :  { %417 = vmatpush3.bf16.msra.mxu0 %v440_v25 }
 0x10e   :  { %v126_v6 = vpop.f32.mrb[0].mxu0 }
 0x10f   :  { %v127_v7 = vadd.f32 %v375_v5, %v126_v6  ;;  %v404_v8 = vpop.f32.mrb[1].mxu0 }
 0x110   :  { %v129_v9 = vpop.f32.mrb[2].mxu0 }
 0x111   :  { %v405_v10 = vpop.f32.mrb[3].mxu0  ;;  %442 = vtanh.f32 %v127_v7  ;;  %v377_v13 = vmul.f32 -1.442695, %v127_v7 }
 0x113   :  { %444 = vpow2.f32 %v377_v13 }
 0x11b   :  { %v443_v11 = vpop.eup %442 }
 0x11c   :  { %146 = vrot.lane.b32.xlu0 %v443_v11, %s529_s15 }
 0x11d   :  { %v445_v14 = vpop.eup %444 }
 0x11e   :  { %v135_v15 = vadd.f32 1.0, %v445_v14 }
 0x120   :  { %141 = vrot.lane.b32.xlu0 %v139_v12, %s535_s24  ;;  %446 = vrcp.f32 %v135_v15 }
 0x12a   :  { %v447_v16 = vpop.eup %446 }
 0x18e   :  { %v147_v17 = vpop.permute.xlu0 %146 }
 0x18f   :  { %v149_v18 = vmul.f32 %v447_v16, %v147_v17 }
 0x191   :  { %151 = vrot.lane.b32.xlu1 %v149_v18, %s535_s24 }
 0x192   :  { %v142_v19 = vpop.permute.xlu0 %141 }
 0x193   :  { %v144_v20 = vmul.f32 %v447_v16, %v142_v19 }
 0x203   :  { %v152_v21 = vpop.permute.xlu1 %151 }
 0x204   :  { %v154_v22 = vadd.f32 %v152_v21, %v144_v20 }
 0x206   :  { %448 = vtanh.f32 %v154_v22 }
 0x210   :  { %v449_v27 = vpop.eup %448 }
 0x211   :  { %157 = vrot.lane.b32.xlu1 %v449_v27, %s529_s15 }
 0x283   :  { %v158_v28 = vpop.permute.xlu1 %157 }
 0x284   :  { %v160_v29 = vmul.f32 %v447_v16, %v158_v28 }
 0x286   :  { %v161_v30 = vpack.c.bf16 %v160_v29, %v160_v29 }
 0x288   :  { %169 = vrot.lane.b32.xlu0 %v161_v30, %s535_s24 }
 0x28c   :  { %301 = vrot.lane.b32.xlu0 %v387_v31, %s535_s24 }
 0x2fa   :  { %v170_v32 = vpop.permute.xlu0 %169 }
 0x2fb   :  { %411 = vmatmul.mubr.msk.bf16.vlgmr.msra.gmra.mrb[0].mxu1 %vm183_vm3, %v170_v32  ;;  %419 = vmatmul.mubr.msk.bf16.vlgmr.msra.gmra.mrb[4].mxu0 %vm183_vm3, %v170_v32 }
 0x2fc   :  { %423 = vmatpush3.bf16.msra.mxu1 %v439_v24  ;;  %426 = vmatprep.mubr.msk.bf16.mxu1 %vm534_vm0, %v533_v0 }
 0x2fd   :  { %424 = vmatprep.subr.bf16.mxu1 %v533_v0 }
 0x2fe   :  { %v302_v52 = vpop.permute.xlu0 %301 }
 0x300   :  { %425 = vmatpush3.bf16.msra.mxu1 %v441_v26 }
 0x3ce   :  { %v221_v35 = vpop.f32.mrb[0].mxu1  ;;  %v285_v36 = vpop.f32.mrb[4].mxu0 }
 0x3cf   :  { %v222_v37 = vadd.f32 %v378_v33, %v221_v35  ;;  %v286_v38 = vadd.f32 %v382_v34, %v285_v36  ;;  %v412_v39 = vpop.f32.mrb[1].mxu1  ;;  %v420_v40 = vpop.f32.mrb[5].mxu0 }
 0x3d0   :  { %v224_v41 = vpop.f32.mrb[2].mxu1  ;;  %v288_v42 = vpop.f32.mrb[6].mxu0 }
 0x3d1   :  { %227 = vst [vmem:[%s683_s8] sm:$0xf] %v222_v37  ;;  %450 = vtanh.f32 %v286_v38  ;;  %v413_v43 = vpop.f32.mrb[3].mxu1  ;;  %v421_v44 = vpop.f32.mrb[7].mxu0  ;;  %v386_v46 = vmul.f32 -1.442695, %v286_v38 }
 0x3d3   :  { %452 = vpow2.f32 %v386_v46 }
 0x3db   :  { %v451_v45 = vpop.eup %450 }
 0x3dc   :  { %306 = vrot.lane.b32.xlu1 %v451_v45, %s529_s15 }
 0x3dd   :  { %v453_v47 = vpop.eup %452 }
 0x3de   :  { %v294_v48 = vadd.f32 1.0, %v453_v47 }
 0x3e0   :  { %454 = vrcp.f32 %v294_v48 }
 0x3ea   :  { %v455_v49 = vpop.eup %454 }
 0x3eb   :  { %v304_v53 = vmul.f32 %v455_v49, %v302_v52 }
 0x44e   :  { %v307_v50 = vpop.permute.xlu1 %306 }
 0x44f   :  { %v309_v51 = vmul.f32 %v455_v49, %v307_v50 }
 0x451   :  { %311 = vrot.lane.b32.xlu1 %v309_v51, %s535_s24 }
 0x4c3   :  { %v312_v54 = vpop.permute.xlu1 %311 }
 0x4c4   :  { %v314_v55 = vadd.f32 %v312_v54, %v304_v53 }
 0x4c6   :  { %456 = vtanh.f32 %v314_v55 }
 0x4d0   :  { %v457_v56 = vpop.eup %456 }
 0x4d1   :  { %317 = vrot.lane.b32.xlu0 %v457_v56, %s529_s15 }
 0x543   :  { %v318_v57 = vpop.permute.xlu0 %317 }
 0x544   :  { %v320_v58 = vmul.f32 %v455_v49, %v318_v57 }
 0x546   :  { %v321_v59 = vpack.c.bf16 %v320_v58, %v320_v58 }
 0x548   :  { %323 = vrot.lane.b32.xlu1 %v321_v59, %s535_s24 }
 0x5ba   :  { %v324_v60 = vpop.permute.xlu1 %323 }
 0x5bb   :  { %427 = vmatmul.mubr.msk.bf16.vlgmr.msra.gmra.mrb[4].mxu1 %vm183_vm3, %v324_v60 }
 0x68e   :  { %v362_v61 = vpop.f32.mrb[4].mxu1 }
 0x68f   :  { %v363_v62 = vadd.f32 %v378_v33, %v362_v61  ;;  %v428_v63 = vpop.f32.mrb[5].mxu1 }
 0x690   :  { %v365_v0 = vpop.f32.mrb[6].mxu1 }
 0x691   :  { %368 = vst [vmem:[%s683_s8 + $0x4] sm:$0xf] %v363_v62  ;;  %v429_v1 = vpop.f32.mrb[7].mxu1 }
 0x692   :  { %373 = vsyncpa [#allocation3], 1 }
 0x693   :  { %374 = vsyncpa [#allocation5], 1 }

</bundles_post_ra>
